<compile_context>
chip_gen: v7x
topology: tpu7x:2x2x1
jax: 0.10.0
libtpu: 0.0.40
codegen_flags: <defaults>
</compile_context>

<pallas_src>
from dataclasses import dataclass

import jax
import jax.numpy as jnp
from jax.experimental import pallas as pl
from jax.experimental.pallas import tpu as pltpu

_LANE = 128
_SUBLANE = 8


def _round_up(n, m):
    return ((n + m - 1) // m) * m


@dataclass(frozen=True)
class _ParamSlot:
    row: int            # row offset inside the slab
    shape: tuple        # logical (rows, cols) stored at [row:row+rows, :cols]


@dataclass(frozen=True)
class DiscriminatorLayout:
    data_dim: int
    hidden_dims: tuple        # per-layer output widths, e.g. (64, 32, 1)
    slots: tuple              # _ParamSlot per param: W1_fused, b1, W2, b2, ..., W_L(or W_L^T), b_L
    last_transposed: bool     # last weight stored as a (1, in) row (out_dim == 1 -> VPU path)
    slab_shape: tuple


def pack_discriminator_params(weights, biases, data_dim, dtype=jnp.float32):
    """Pack every Linear weight/bias into one lane-dense VMEM slab (done ONCE).

    weights[i]: (in_i, out_i)  (already transposed vs PyTorch's (out, in));
    weights[0] has in dim == 2*data_dim (concat of x and its batch mean) and is
    re-fused into [W1_x | W1_m] of shape (data_dim, 2*H1) so the kernel needs a
    single matmul for layer 1.  Use dtype=jnp.bfloat16 on v6e/v7x.
    """
    assert len(weights) >= 2, "expected at least two Linear layers"
    assert weights[0].shape[0] == 2 * data_dim, "first layer expects cat([x, mean])"

    w1_fused = jnp.concatenate(
        [weights[0][:data_dim, :], weights[0][data_dim:, :]], axis=1)     # (D, 2*H1)

    last_transposed = weights[-1].shape[1] == 1
    entries = [w1_fused, biases[0].reshape(1, -1)]
    for i in range(1, len(weights)):
        w = weights[i]
        if i == len(weights) - 1 and last_transposed:
            w = w.T                                   # store as a (1, in) row for the VPU reduce
        entries.append(w)
        entries.append(biases[i].reshape(1, -1))

    lanes = _round_up(max(e.shape[1] for e in entries), _LANE)
    slots, row = [], 0
    for e in entries:
        slots.append(_ParamSlot(row=row, shape=tuple(e.shape)))
        row += _round_up(e.shape[0], _SUBLANE)
    rows = _round_up(row, _SUBLANE)

    slab = jnp.zeros((rows, lanes), dtype)
    for e, s in zip(entries, slots):
        slab = slab.at[s.row:s.row + e.shape[0], :e.shape[1]].set(e.astype(dtype))

    layout = DiscriminatorLayout(
        data_dim=data_dim,
        hidden_dims=tuple(w.shape[1] for w in weights),
        slots=tuple(slots),
        last_transposed=last_transposed,
        slab_shape=(rows, lanes),
    )
    return slab, layout


def _make_kernel(layout, batch, out_pad):
    D = layout.data_dim
    dims = layout.hidden_dims
    h1 = dims[0]
    nl = len(dims)
    slots = layout.slots
    inv_b = 1.0 / float(batch)

    def act(h, width):
        if width > 1:
            return jnp.maximum(h, 0.0)
        # sigmoid: exp on the EUP, divide via EUP reciprocal (free slot)
        return pl.reciprocal(1.0 + jnp.exp(-h), approx=True)

    def kernel(x_ref, p_ref, o_ref):
        x = x_ref[...]                                              # (B, D)

        # ---- Layer 1: one fused 128-lane matmul replaces x@W1x + mean@W1m ----
        s_w1, s_b1 = slots[0], slots[1]
        w1 = p_ref[s_w1.row:s_w1.row + D, :2 * h1]                  # (D, 2*H1), static view
        z = jnp.dot(x.astype(w1.dtype), w1,
                    preferred_element_type=jnp.float32)             # (B, 2*H1) f32 acc
        b1 = p_ref[s_b1.row:s_b1.row + 1, :h1].astype(jnp.float32)  # (1, H1)
        # minibatch-mean term AFTER the matmul (off the MXU critical path):
        # mean_row @ W1_m == (1/B) * sum_b (x_b @ W1_m)
        mean_term = jnp.sum(z[:, h1:2 * h1], axis=0, keepdims=True) * inv_b
        h = act(z[:, :h1] + mean_term + b1, h1)

        # ---- Middle layers (MXU, f32 accumulate, f32 epilogue) ----
        for li in range(1, nl - 1):
            s_w, s_b = slots[2 * li], slots[2 * li + 1]
            in_d, out_d = s_w.shape
            w = p_ref[s_w.row:s_w.row + in_d, :out_d]
            b = p_ref[s_b.row:s_b.row + 1, :out_d].astype(jnp.float32)
            h = act(jnp.dot(h.astype(w.dtype), w,
                            preferred_element_type=jnp.float32) + b, out_d)

        # ---- Last layer ----
        s_w, s_b = slots[2 * (nl - 1)], slots[2 * (nl - 1) + 1]
        if layout.last_transposed:
            # out_dim == 1: VPU multiply + lane reduce instead of a 1-lane MXU matmul
            in_d = s_w.shape[1]
            w_row = p_ref[s_w.row:s_w.row + 1, :in_d].astype(jnp.float32)   # (1, in)
            b_last = p_ref[s_b.row:s_b.row + 1, 0:1].astype(jnp.float32)    # (1, 1)
            logit = jnp.sum(h * w_row, axis=-1, keepdims=True) + b_last     # (B, 1)
            out = act(logit, 1)
            # lane-dense store; logical column extracted outside the kernel
            o_ref[...] = jnp.broadcast_to(out, (batch, out_pad)).astype(o_ref.dtype)
        else:
            in_d, out_d = s_w.shape
            w = p_ref[s_w.row:s_w.row + in_d, :out_pad]      # zero lane padding -> lane-dense result
            b = p_ref[s_b.row:s_b.row + 1, :out_pad].astype(jnp.float32)
            out = act(jnp.dot(h.astype(w.dtype), w,
                              preferred_element_type=jnp.float32) + b, out_d)
            o_ref[...] = out.astype(o_ref.dtype)

    return kernel


def make_discriminator_forward(layout, batch, out_dtype=jnp.float32):
    """Returns a jitted forward(x, packed_param_slab) -> (B, out_dim)."""
    out_dim = layout.hidden_dims[-1]
    out_pad = _round_up(out_dim, _LANE)
    kernel = _make_kernel(layout, batch, out_pad)

    call = pl.pallas_call(
        kernel,
        out_shape=jax.ShapeDtypeStruct((batch, out_pad), out_dtype),
        in_specs=[pl.BlockSpec(memory_space=pltpu.MemorySpace.VMEM),   # x
                  pl.BlockSpec(memory_space=pltpu.MemorySpace.VMEM)],  # packed params
        out_specs=pl.BlockSpec(memory_space=pltpu.MemorySpace.VMEM),
    )

    @jax.jit
    def forward(x, slab):
        return call(x, slab)[:, :out_dim]   # drop the lane padding outside the kernel

    return forward


def reference_discriminator(x, weights, biases):
    """Pure-JAX reference matching the PyTorch module exactly."""
    mean = jnp.mean(x, axis=0, keepdims=True)
    h = jnp.concatenate([x, jnp.broadcast_to(mean, x.shape)], axis=1)
    for w, b in zip(weights, biases):
        h = jnp.dot(h, w, precision=jax.lax.Precision.HIGHEST) + b[None, :]
        h = jnp.maximum(h, 0.0) if w.shape[1] > 1 else jax.nn.sigmoid(h)
    return h


if __name__ == "__main__":
    key = jax.random.PRNGKey(0)

    batch = 8
    data_dim = 32
    hidden_dims = (64, 32, 1)           # medgan-style: ReLU, ReLU, Sigmoid

    keys = jax.random.split(key, 1 + 2 * len(hidden_dims))
    x = jax.random.normal(keys[0], (batch, data_dim), dtype=jnp.float32)

    # PyTorch Linear-style uniform init (bound 1/sqrt(fan_in)), pre-transposed to (in, out).
    weights, biases = [], []
    in_dim = 2 * data_dim
    for i, h in enumerate(hidden_dims):
        bound = float(in_dim) ** -0.5
        w = jax.random.uniform(keys[1 + 2 * i], (in_dim, h),
                               minval=-bound, maxval=bound, dtype=jnp.float32)
        b = jax.random.uniform(keys[2 + 2 * i], (h,),
                               minval=-bound, maxval=bound, dtype=jnp.float32)
        weights.append(w)
        biases.append(b)
        in_dim = h

    # One-time param packing (use dtype=jnp.bfloat16 on v6e/v7x for full-rate MXU;
    # f32 here so the correctness check against the HIGHEST-precision reference is tight).
    slab, layout = pack_discriminator_params(weights, biases, data_dim, dtype=jnp.float32)
    forward = make_discriminator_forward(layout, batch)

    out = jax.block_until_ready(forward(x, slab))

    ref = reference_discriminator(x, weights, biases)
    assert out.shape == (batch, hidden_dims[-1])
    max_err = float(jnp.max(jnp.abs(out - ref)))
    # Tolerance relaxed vs 1e-4: kernel uses default MXU precision + approx EUP
    # reciprocal, reference uses Precision.HIGHEST.
    assert jnp.allclose(out, ref, atol=2e-3, rtol=2e-3), f"max abs err = {max_err}"

    print("KERNEL_OK")
</pallas_src>

<mosaic_0001>
module attributes {stable_mosaic.version = 11 : i64} {
  func.func @kernel(%arg0: memref<8x32xf32, #tpu.memory_space<vmem>>, %arg1: memref<128x128xf32, #tpu.memory_space<vmem>>, %arg2: memref<8x128xf32, #tpu.memory_space<vmem>>) attributes {dimension_semantics = [], scalar_prefetch = 0 : i64, scratch_operands = 0 : i64, tpu.core_type = #tpu.core_type<tc>} {
    %c0 = arith.constant 0 : index
    %c0_0 = arith.constant 0 : index
    %0 = vector.load %arg0[%c0, %c0_0] : memref<8x32xf32, #tpu.memory_space<vmem>>, vector<8x32xf32>
    %c0_1 = arith.constant 0 : index
    %c0_2 = arith.constant 0 : index
    %1 = vector.load %arg1[%c0_1, %c0_2] : memref<128x128xf32, #tpu.memory_space<vmem>>, vector<32x128xf32>
    %cst = arith.constant dense<0.000000e+00> : vector<8x128xf32>
    %2 = tpu.matmul %0, %1, %cst {dimension_numbers = #tpu.dot_dimension_numbers<[1], [0], [0], [1], [0, 0, 1, 1], [], []>} : vector<8x32xf32>, vector<32x128xf32>, vector<8x128xf32> -> vector<8x128xf32>
    %c32 = arith.constant 32 : index
    %c0_3 = arith.constant 0 : index
    %3 = vector.load %arg1[%c32, %c0_3] : memref<128x128xf32, #tpu.memory_space<vmem>>, vector<1x64xf32>
    %4 = vector.extract_strided_slice %2 {offsets = [0, 64], sizes = [8, 64], strides = [1, 1]} : vector<8x128xf32> to vector<8x64xf32>
    %cst_4 = arith.constant dense<0.000000e+00> : vector<64xf32>
    %5 = vector.multi_reduction <add>, %4, %cst_4 [0] : vector<8x64xf32> to vector<64xf32>
    %6 = vector.shape_cast %5 : vector<64xf32> to vector<1x64xf32>
    %cst_5 = arith.constant 1.250000e-01 : f32
    %7 = vector.broadcast %cst_5 : f32 to vector<1x64xf32>
    %8 = arith.mulf %6, %7 : vector<1x64xf32>
    %9 = vector.extract_strided_slice %2 {offsets = [0, 0], sizes = [8, 64], strides = [1, 1]} : vector<8x128xf32> to vector<8x64xf32>
    %10 = vector.broadcast %8 : vector<1x64xf32> to vector<8x64xf32>
    %11 = arith.addf %9, %10 : vector<8x64xf32>
    %12 = vector.broadcast %3 : vector<1x64xf32> to vector<8x64xf32>
    %13 = arith.addf %11, %12 : vector<8x64xf32>
    %cst_6 = arith.constant 0.000000e+00 : f32
    %14 = vector.broadcast %cst_6 : f32 to vector<8x64xf32>
    %15 = arith.maximumf %13, %14 : vector<8x64xf32>
    %c40 = arith.constant 40 : index
    %c0_7 = arith.constant 0 : index
    %16 = vector.load %arg1[%c40, %c0_7] : memref<128x128xf32, #tpu.memory_space<vmem>>, vector<64x32xf32>
    %c104 = arith.constant 104 : index
    %c0_8 = arith.constant 0 : index
    %17 = vector.load %arg1[%c104, %c0_8] : memref<128x128xf32, #tpu.memory_space<vmem>>, vector<1x32xf32>
    %cst_9 = arith.constant dense<0.000000e+00> : vector<8x32xf32>
    %18 = tpu.matmul %15, %16, %cst_9 {dimension_numbers = #tpu.dot_dimension_numbers<[1], [0], [0], [1], [0, 0, 1, 1], [], []>} : vector<8x64xf32>, vector<64x32xf32>, vector<8x32xf32> -> vector<8x32xf32>
    %19 = vector.broadcast %17 : vector<1x32xf32> to vector<8x32xf32>
    %20 = arith.addf %18, %19 : vector<8x32xf32>
    %cst_10 = arith.constant 0.000000e+00 : f32
    %21 = vector.broadcast %cst_10 : f32 to vector<8x32xf32>
    %22 = arith.maximumf %20, %21 : vector<8x32xf32>
    %c112 = arith.constant 112 : index
    %c0_11 = arith.constant 0 : index
    %23 = vector.load %arg1[%c112, %c0_11] : memref<128x128xf32, #tpu.memory_space<vmem>>, vector<1x32xf32>
    %c120 = arith.constant 120 : index
    %c0_12 = arith.constant 0 : index
    %24 = vector.load %arg1[%c120, %c0_12] : memref<128x128xf32, #tpu.memory_space<vmem>>, vector<1x1xf32>
    %25 = vector.broadcast %23 : vector<1x32xf32> to vector<8x32xf32>
    %26 = arith.mulf %22, %25 : vector<8x32xf32>
    %cst_13 = arith.constant dense<0.000000e+00> : vector<8xf32>
    %27 = vector.multi_reduction <add>, %26, %cst_13 [1] : vector<8x32xf32> to vector<8xf32>
    %28 = vector.shape_cast %27 : vector<8xf32> to vector<8x1xf32>
    %29 = vector.broadcast %24 : vector<1x1xf32> to vector<8x1xf32>
    %30 = arith.addf %28, %29 : vector<8x1xf32>
    %cst_14 = arith.constant 0.000000e+00 : f32
    %31 = vector.broadcast %cst_14 : f32 to vector<8x1xf32>
    %32 = arith.subf %31, %30 : vector<8x1xf32>
    %33 = math.exp %32 : vector<8x1xf32>
    %cst_15 = arith.constant 1.000000e+00 : f32
    %34 = vector.broadcast %cst_15 : f32 to vector<8x1xf32>
    %35 = arith.addf %34, %33 : vector<8x1xf32>
    %36 = tpu.reciprocal %35 {approx = true} : vector<8x1xf32> -> vector<8x1xf32>
    %37 = vector.shape_cast %36 : vector<8x1xf32> to vector<8x1xf32>
    %38 = vector.broadcast %37 : vector<8x1xf32> to vector<8x128xf32>
    %c0_16 = arith.constant 0 : index
    %c0_17 = arith.constant 0 : index
    %39 = vector.load %arg2[%c0_16, %c0_17] : memref<8x128xf32, #tpu.memory_space<vmem>>, vector<8x128xf32>
    tpu.vector_store %arg2[%c0_16, %c0_17], %38 {strides = array<i32>} : memref<8x128xf32, #tpu.memory_space<vmem>>, vector<8x128xf32>,
    return
  }
}

</mosaic_0001>

<bundles_post_ra>
// kernel: forward.1
= control target key start
LH: loop header
LB: loop body
LE: loop exit
PB: predicated region body
PF: predicated region fallthrough
CT: control target
= control target key end

     0   :  { %7 = vsyncpa [#allocation3], 0  ;;  %s448_s0 = inlined_call_operand.hbm [shape: f32[8,32], index: 0, kind: input, shape index: {}]   ;;  %s449_s1 = inlined_call_operand.hbm [shape: f32[128,128], index: 1, kind: input, shape index: {}]   ;;  %s450_s2 = inlined_call_operand.vmem [shape: f32[8,128], index: 2, kind: output, shape index: {}]  }
   0x1   :  { %8 = vsyncpa [#allocation5], 0  ;;  %s388_s9 = smov [#allocation2]   ;;  %s389_s11 = smov [#allocation4]  }
   0x2   :  { %s15_s10 = sshll.u32 %s388_s9, 4  ;;  %s24_s12 = sshll.u32 %s389_s11, 4  ;;  %s16_s10 = int_to_ptr.vmem [resolvable:$true] %s15_s10  ;;  %s412_s12 = int_to_ptr.vmem [resolvable:$true] %s24_s12 }
   0x3   :  { %s340_s15 = scalar_lea.hbm %s448_s0, 128 }
   0x4   :  { %p341_p0 = scmp.ne.s32.totalorder %s448_s0, %s340_s15  ;;  %p344_p1 = scmp.lt.u32.totalorder %s340_s15, %s448_s0 }
   0x6   :  { %p346_p2 = pnand %p344_p1, %p341_p0 }
   0x8   :  { %349 = shalt.err (!%p346_p2)
}
   0x9   :  { %s350_s20 = scalar_lea.vmem %s16_s10, 128  ;;  %p355_p4 = scmp.lt.s32.totalorder %s16_s10, %s16_s10 }
   0xa   :  { %p351_p3 = scmp.ne.s32.totalorder %s16_s10, %s350_s20  ;;  %p356_p5 = scmp.lt.s32.totalorder %s350_s20, %s350_s20 }
   0xc   :  { %p357_p6 = por %p356_p5, %p355_p4 }
   0xe   :  { %p358_p7 = pnand %p357_p6, %p351_p3 }
  0x10   :  { %361 = shalt.err (!%p358_p7)
}
  0x11   :  { %18 = dma.hbm_to_vmem [thread:$0]  %s448_s0, 128, %s16_s10, [#allocation3]  }
  0x12   :  { %s362_s25 = scalar_lea.hbm %s449_s1, 2048 }
  0x13   :  { %p363_p8 = scmp.ne.s32.totalorder %s449_s1, %s362_s25  ;;  %p366_p9 = scmp.lt.u32.totalorder %s362_s25, %s449_s1 }
  0x15   :  { %p368_p10 = pnand %p366_p9, %p363_p8 }
  0x17   :  { %371 = shalt.err (!%p368_p10)
}
  0x18   :  { %s372_s30 = scalar_lea.vmem %s412_s12, 2048  ;;  %p377_p12 = scmp.lt.s32.totalorder %s412_s12, %s412_s12 }
  0x19   :  { %p373_p11 = scmp.ne.s32.totalorder %s412_s12, %s372_s30  ;;  %p378_p13 = scmp.lt.s32.totalorder %s372_s30, %s372_s30 }
  0x1b   :  { %p379_p0 = por %p378_p13, %p377_p12 }
  0x1d   :  { %p380_p1 = pnand %p379_p0, %p373_p11 }
  0x1f   :  { %383 = shalt.err (!%p380_p1)
}
  0x20   :  { %s390_s0 = smov 128   ;;  %s391_s3 = smov 8  }
  0x21   :  { %30 = dma.hbm_to_vmem [thread:$0]  %s449_s1, 2048, %s412_s12, [#allocation5], %s390_s0, %s390_s0, %s391_s3  }
  0x22   :  { %384 = dma.done.wait [#allocation3], 128  }
  0x23   :  { %385 = vsyncadd [#allocation3], 4294967168 }
  0x24   :  { %386 = dma.done.wait [#allocation5], 2048  }
  0x25   :  { %387 = vsyncadd [#allocation5], 4294965248  ;;  %v392_v0 = vmov 0.0|0.0   ;;  %vm393_vm0 = vmmov 0   ;;  %v394_v1 = vmov 0.0   ;;  %v38_v2 = vld [vmem:[#allocation4] sm:$0xff] }
  0x26   :  { %307 = vmatprep.subr.bf16.mxu0 %v392_v0  ;;  %285 = vmatprep.mubr.msk.f32.mxu0 %vm393_vm0, %v394_v1  ;;  %v39_v3 = vld [vmem:[#allocation4 + $0x8] sm:$0xff]  ;;  %v40_v4 = vld [vmem:[#allocation4 + $0x10] sm:$0xff]  ;;  %v41_v6 = vld [vmem:[#allocation4 + $0x18] sm:$0xff]  ;;  %vm42_vm1 = vcmask 261120   ;;  %vm117_vm2 = vcmask 1048064   ;;  %s395_s1 = smov 64  }
  0x27   :  { %313 = vmatprep.subr.bf16.mxu1 %v392_v0  ;;  %304 = vmatprep.mubr.msk.f32.mxu1 %vm393_vm0, %v394_v1  ;;  %v308_v5 = vpack.c.bf16 %v39_v3, %v38_v2  ;;  %v311_v7 = vpack.c.bf16 %v41_v6, %v40_v4  ;;  %v37_v8 = vld [vmem:[#allocation2] sm:$0xff]  ;;  %v137_v9 = vld [vmem:[#allocation4 + $0x28] sm:$0xff]  ;;  %v138_v10 = vld [vmem:[#allocation4 + $0x30] sm:$0xff]  ;;  %vm150_vm3 = vcmask 523264   ;;  %v396_v44 = vmov 0  }
  0x28   :  { %v139_v11 = vld [vmem:[#allocation4 + $0x38] sm:$0xff]  ;;  %v314_v12 = vpack.c.bf16 %v138_v10, %v137_v9  ;;  %v140_v13 = vld [vmem:[#allocation4 + $0x40] sm:$0xff]  ;;  %v141_v15 = vld [vmem:[#allocation4 + $0x48] sm:$0xff]  ;;  %334 = vset.pattern.permute.xlu1 %v396_v44  ;;  %335 = vset.pattern.permute.xlu0 %v396_v44 }
  0x29   :  { %309 = vmatpush3.bf16.msra.mxu0 %v308_v5  ;;  %v317_v14 = vpack.c.bf16 %v140_v13, %v139_v11  ;;  %v142_v16 = vld [vmem:[#allocation4 + $0x50] sm:$0xff]  ;;  %v143_v22 = vld [vmem:[#allocation4 + $0x58] sm:$0xff]  ;;  %v144_v23 = vld [vmem:[#allocation4 + $0x60] sm:$0xff] }
  0x2a   :  { %310 = vmatprep.subr.bf16.mxu0 %v392_v0  ;;  %315 = vmatpush3.bf16.msra.mxu1 %v314_v12  ;;  %v320_v17 = vpack.c.bf16 %v142_v16, %v141_v15  ;;  %v323_v25 = vpack.c.bf16 %v144_v23, %v143_v22  ;;  %v258_v31 = vld [vmem:[#allocation4 + $0x20] ss:$0 sm:$0xff]  ;;  %v259_v36 = vld [vmem:[#allocation4 + $0x68] ss:$0 sm:$0xff]  ;;  %v261_v40 = vld [vmem:[#allocation4 + $0x70] ss:$0 sm:$0xff] }
  0x2b   :  { %316 = vmatprep.subr.bf16.mxu1 %v392_v0  ;;  %v262_v45 = vld [vmem:[#allocation4 + $0x78] ss:$0 sm:$0xff] }
  0x2d   :  { %312 = vmatpush3.bf16.msra.mxu0 %v311_v7 }
  0x2e   :  { %318 = vmatpush3.bf16.msra.mxu1 %v317_v14 }
  0x2f   :  { %319 = vmatprep.subr.bf16.mxu1 %v392_v0 }
  0x30   :  { %286 = vmatmul.mubr.msk.f32.vlgmr.msra.gmra.mrb[0].mxu0 %vm42_vm1, %v37_v8 }
  0x32   :  { %321 = vmatpush3.bf16.msra.mxu1 %v320_v17 }
  0x33   :  { %322 = vmatprep.subr.bf16.mxu1 %v392_v0 }
  0x36   :  { %324 = vmatpush3.bf16.msra.mxu1 %v323_v25 }
 0x103   :  { %v112_v18 = vpop.f32.mrb[0].mxu0 }
 0x104   :  { %v118_v19 = vsel %vm117_vm2, %v112_v18, 0.0  ;;  %v287_v20 = vpop.f32.mrb[1].mxu0 }
 0x105   :  { %v119_v21 = vrot.slane %v118_v19, 4 }
 0x107   :  { %v120_v24 = vadd.f32 %v119_v21, %v118_v19 }
 0x109   :  { %v121_v26 = vrot.slane %v120_v24, 2 }
 0x10b   :  { %v122_v27 = vadd.f32 %v121_v26, %v120_v24 }
 0x10d   :  { %v123_v28 = vrot.slane %v122_v27, 1 }
 0x10f   :  { %v124_v29 = vadd.f32 %v123_v28, %v122_v27 }
 0x111   :  { %v125_v30 = vmul.f32 0.125, %v124_v29 }
 0x113   :  { %127 = vrot.lane.b32.xlu0 %v125_v30, %s395_s1 }
 0x185   :  { %v128_v32 = vpop.permute.xlu0 %127 }
 0x186   :  { %v130_v33 = vadd.f32 %v128_v32, %v112_v18 }
 0x188   :  { %v135_v34 = vadd.f32 %v258_v31, %v130_v33 }
 0x18a   :  { %v136_v35 = vmax.f32 %v135_v34, 0.0 }
 0x18c   :  { %305 = vmatmul.mubr.msk.f32.vlgmr.msra.gmra.mrb[0].mxu1 %vm150_vm3, %v136_v35 }
 0x25f   :  { %v220_v37 = vpop.f32.mrb[0].mxu1 }
 0x260   :  { %v221_v38 = vadd.f32 %v259_v36, %v220_v37  ;;  %v306_v39 = vpop.f32.mrb[1].mxu1 }
 0x262   :  { %v224_v41 = vmax.f32 %v221_v38, 0.0 }
 0x264   :  { %v231_v42 = vmul.f32 %v261_v40, %v224_v41 }
 0x266   :  { %v232_v43 = vsel %vm42_vm1, %v231_v42, 0.0 }
 0x267   :  { %233 = vadd.xlane.f32.xlu0 %v232_v43 }
 0x2f4   :  { %v234_v46 = vpop.xlane.xlu0 %233 }
 0x2f5   :  { %v239_v47 = vadd.f32 %v262_v45, %v234_v46 }
 0x2f7   :  { %v240_v48 = vsub.f32 0.0, %v239_v47 }
 0x2f9   :  { %v241_v49 = vmul.f32 1.442695, %v240_v48 }
 0x2fb   :  { %336 = vpow2.f32 %v241_v49 }
 0x305   :  { %v337_v50 = vpop.eup %336 }
 0x306   :  { %v243_v51 = vadd.f32 1.0, %v337_v50 }
 0x308   :  { %338 = vrcp.f32 %v243_v51 }
 0x312   :  { %v339_v52 = vpop.eup %338 }
 0x313   :  { %247 = vperm.xlu1 %334, %v339_v52  }
 0x392   :  { %v248_v53 = vpop.permute.xlu1 %247 }
 0x393   :  { %250 = vst [vmem:[%s450_s2] sm:$0xff] %v248_v53 }
 0x394   :  { %255 = vsyncpa [#allocation3], 1 }
 0x395   :  { %256 = vsyncpa [#allocation5], 1 }

</bundles_post_ra>
